<compile_context>
chip_gen: v7x
topology: tpu7x:2x2x1
jax: 0.10.0
libtpu: 0.0.40
codegen_flags: <defaults>
</compile_context>

<pallas_src>
import math

import jax
import jax.numpy as jnp
from jax.experimental import pallas as pl
from jax.experimental.pallas import tpu as pltpu


# ---------------------------------------------------------------------------
# Pallas kernel: hoisted L2-normalize + batched dot + bias + sigmoid.
# ---------------------------------------------------------------------------
def _urm_kernel(demb_ref, bias_ref, uemb_ref, out_ref):
    d = demb_ref[...].astype(jnp.float32)          # (bt, S, F)
    u = uemb_ref[...].astype(jnp.float32)          # (bt, F)

    raw = jnp.sum(d * u[:, None, :], axis=-1)      # (bt, S)  sum_f d*u
    sumsq = jnp.sum(d * d, axis=-1)                # (bt, S)  sum_f d*d

    # F.normalize eps clamp (max(||x||, 1e-12)), hoisted out of the F axis.
    # Exact divide over (bt, S) only, to keep tight numerics vs. the reference.
    scores = raw / jnp.maximum(jnp.sqrt(sumsq), 1e-12)

    out_ref[...] = jax.nn.sigmoid(scores + bias_ref[...])


def _auto_b_tile(batch, row_bytes):
    """Pick a large batch tile that fits VMEM and keeps >= 2 grid steps."""
    vmem_budget = 24 * 1024 * 1024                 # per-step (double-buffered -> ~2x)
    cap = max(8, (vmem_budget // (2 * max(row_bytes, 1))) // 8 * 8)
    target = min(1024, cap)
    if batch >= 2 * target:
        return target
    bt = max(8, -(-batch // 2))                    # ceil(B/2): >= 2 grid steps
    bt = min(-(-bt // 8) * 8, target)              # sublane-multiple
    return bt


def urm_forward_pallas(d_emb, bias, u_emb, *, b_tile=None):
    """d_emb (B,S,F) bf16/f32, bias (B,S) f32, u_emb (B,F) bf16/f32 -> p (B,S) f32."""
    B, S, F = d_emb.shape
    assert bias.shape == (B, S) and u_emb.shape == (B, F)

    row_bytes = (S * F * d_emb.dtype.itemsize      # doc embeddings
                 + S * bias.dtype.itemsize         # combined bias
                 + F * u_emb.dtype.itemsize        # user embedding
                 + S * 4)                          # f32 output
    if b_tile is None:
        b_tile = _auto_b_tile(B, row_bytes)

    num_tiles = pl.cdiv(B, b_tile)
    b_pad = num_tiles * b_tile
    if b_pad != B:
        pad = b_pad - B
        d_emb = jnp.pad(d_emb, ((0, pad), (0, 0), (0, 0)))
        bias = jnp.pad(bias, ((0, pad), (0, 0)))
        u_emb = jnp.pad(u_emb, ((0, pad), (0, 0)))

    out = pl.pallas_call(
        _urm_kernel,
        out_shape=jax.ShapeDtypeStruct((b_pad, S), jnp.float32),
        grid_spec=pltpu.PrefetchScalarGridSpec(
            num_scalar_prefetch=0,
            grid=(num_tiles,),
            in_specs=[
                pl.BlockSpec((b_tile, S, F), lambda i: (i, 0, 0)),
                pl.BlockSpec((b_tile, S), lambda i: (i, 0)),
                pl.BlockSpec((b_tile, F), lambda i: (i, 0)),
            ],
            out_specs=pl.BlockSpec((b_tile, S), lambda i: (i, 0)),
        ),
        compiler_params=pltpu.CompilerParams(
            dimension_semantics=("parallel",),
            vmem_limit_bytes=48 * 1024 * 1024,     # headroom under v7x 64 MiB
        ),
    )(d_emb, bias, u_emb)

    return out[:B] if b_pad != B else out


# ---------------------------------------------------------------------------
# URM module in JAX: deterministic parameter construction + forward wrapper.
# ---------------------------------------------------------------------------
class URM:
    def __init__(self, maxIID, maxUID, slate_size, latent_size, key,
                 embed_dtype=jnp.bfloat16):
        self.maxIID = maxIID
        self.maxUID = maxUID
        self.slateSize = slate_size
        self.featureSize = latent_size

        a = math.sqrt(2.0 / latent_size)
        k_doc, k_user = jax.random.split(key)
        # nn.Embedding(n+1, f).uniform_(-a, a); stored bf16 to halve HBM bytes.
        self.docEmbed = jax.random.uniform(
            k_doc, (maxIID + 1, latent_size), jnp.float32,
            minval=-a, maxval=a).astype(embed_dtype)
        self.userEmbed = jax.random.uniform(
            k_user, (maxUID + 1, latent_size), jnp.float32,
            minval=-a, maxval=a).astype(embed_dtype)
        # Biases initialized to zeros, exactly as in the reference __init__.
        self.itemBias = jnp.zeros((maxIID + 1, 1), jnp.float32)
        self.userBias = jnp.zeros((maxUID + 1, 1), jnp.float32)

    def forward(self, slates, users, *, b_tile=None):
        """slates: (B, slateSize) int32 item ids; users: (B,) int32 user ids."""
        B, S = slates.shape
        assert S == self.slateSize
        users = users.reshape(B)

        # Embedding lookups (glue: pure gathers) + pre-combined bias.
        d_emb = self.docEmbed[slates]                               # (B, S, F)
        u_emb = self.userEmbed[users]                               # (B, F)
        bias = (self.itemBias[slates][..., 0]
                + self.userBias[users]).astype(jnp.float32)         # (B, S)

        # Hot path (normalize + batched dot + bias + sigmoid) in Pallas.
        return urm_forward_pallas(d_emb, bias, u_emb, b_tile=b_tile)


# ---------------------------------------------------------------------------
# Reference (pure JAX) for a correctness sanity check (same bf16 params).
# ---------------------------------------------------------------------------
def urm_forward_ref(model, slates, users):
    B, S = slates.shape
    users = users.reshape(B)
    d = model.docEmbed[slates].astype(jnp.float32)
    dn = d / jnp.maximum(
        jnp.sqrt(jnp.sum(d * d, axis=-1, keepdims=True)), 1e-12)
    u = model.userEmbed[users].astype(jnp.float32)
    logits = (jnp.einsum("bsf,bf->bs", dn, u)
              + model.itemBias[slates][..., 0]
              + model.userBias[users])
    return jax.nn.sigmoid(logits)


if __name__ == "__main__":
    key = jax.random.PRNGKey(0)
    k_param, k_slate, k_user = jax.random.split(key, 3)

    maxIID = 50
    maxUID = 20
    slate_size = 8
    latent_size = 32
    batch = 16

    model = URM(maxIID, maxUID, slate_size, latent_size, k_param)

    slates = jax.random.randint(
        k_slate, (batch, slate_size), 0, maxIID + 1, dtype=jnp.int32)
    users = jax.random.randint(
        k_user, (batch,), 0, maxUID + 1, dtype=jnp.int32)

    # Main run (auto tile -> 8-row tiles, 2 grid steps at this batch).
    p = jax.block_until_ready(model.forward(slates, users))
    p_ref = jax.block_until_ready(urm_forward_ref(model, slates, users))
    assert p.shape == (batch, slate_size)
    assert jnp.allclose(p, p_ref, atol=1e-5, rtol=1e-5), (
        float(jnp.max(jnp.abs(p - p_ref))))

    # Also exercise the padding path (batch not a multiple of the tile).
    p2 = jax.block_until_ready(model.forward(slates[:13], users[:13]))
    p2_ref = jax.block_until_ready(urm_forward_ref(model, slates[:13], users[:13]))
    assert p2.shape == (13, slate_size)
    assert jnp.allclose(p2, p2_ref, atol=1e-5, rtol=1e-5), (
        float(jnp.max(jnp.abs(p2 - p2_ref))))

    print("KERNEL_OK")
</pallas_src>

<mosaic_0001>
module attributes {stable_mosaic.version = 11 : i64} {
  func.func @_urm_kernel(%arg0: i32, %arg1: memref<8x8x32xbf16, #tpu.memory_space<vmem>>, %arg2: memref<8x8xf32, #tpu.memory_space<vmem>>, %arg3: memref<8x32xbf16, #tpu.memory_space<vmem>>, %arg4: memref<8x8xf32, #tpu.memory_space<vmem>>) attributes {dimension_semantics = [#tpu.dimension_semantics<parallel>], iteration_bounds = array<i64: 2>, scalar_prefetch = 0 : i64, scratch_operands = 0 : i64, tpu.core_type = #tpu.core_type<tc>, window_params = [{transform_indices = @transform_0, window_bounds = array<i64: 8, 8, 32>}, {transform_indices = @transform_1, window_bounds = array<i64: 8, 8>}, {transform_indices = @transform_2, window_bounds = array<i64: 8, 32>}, {transform_indices = @transform_3, window_bounds = array<i64: 8, 8>}]} {
    %c0 = arith.constant 0 : index
    %c0_0 = arith.constant 0 : index
    %c0_1 = arith.constant 0 : index
    %0 = vector.load %arg1[%c0, %c0_0, %c0_1] : memref<8x8x32xbf16, #tpu.memory_space<vmem>>, vector<8x8x32xbf16>
    %1 = arith.extf %0 : vector<8x8x32xbf16> to vector<8x8x32xf32>
    %c0_2 = arith.constant 0 : index
    %c0_3 = arith.constant 0 : index
    %2 = vector.load %arg3[%c0_2, %c0_3] : memref<8x32xbf16, #tpu.memory_space<vmem>>, vector<8x32xbf16>
    %3 = arith.extf %2 : vector<8x32xbf16> to vector<8x32xf32>
    %4 = vector.shape_cast %3 : vector<8x32xf32> to vector<8x1x32xf32>
    %5 = vector.broadcast %4 : vector<8x1x32xf32> to vector<8x8x32xf32>
    %6 = arith.mulf %1, %5 : vector<8x8x32xf32>
    %cst = arith.constant dense<0.000000e+00> : vector<8x8xf32>
    %7 = vector.multi_reduction <add>, %6, %cst [2] : vector<8x8x32xf32> to vector<8x8xf32>
    %8 = arith.mulf %1, %1 : vector<8x8x32xf32>
    %cst_4 = arith.constant dense<0.000000e+00> : vector<8x8xf32>
    %9 = vector.multi_reduction <add>, %8, %cst_4 [2] : vector<8x8x32xf32> to vector<8x8xf32>
    %10 = math.sqrt %9 : vector<8x8xf32>
    %cst_5 = arith.constant 9.99999996E-13 : f32
    %11 = vector.broadcast %cst_5 : f32 to vector<8x8xf32>
    %12 = arith.maximumf %10, %11 : vector<8x8xf32>
    %13 = arith.divf %7, %12 : vector<8x8xf32>
    %c0_6 = arith.constant 0 : index
    %c0_7 = arith.constant 0 : index
    %14 = vector.load %arg2[%c0_6, %c0_7] : memref<8x8xf32, #tpu.memory_space<vmem>>, vector<8x8xf32>
    %15 = arith.addf %13, %14 : vector<8x8xf32>
    %16 = arith.negf %15 : vector<8x8xf32>
    %17 = math.exp %16 : vector<8x8xf32>
    %cst_8 = arith.constant 1.000000e+00 : f32
    %18 = vector.broadcast %cst_8 : f32 to vector<8x8xf32>
    %19 = arith.addf %18, %17 : vector<8x8xf32>
    %20 = arith.divf %18, %19 : vector<8x8xf32>
    %c0_9 = arith.constant 0 : index
    %c0_10 = arith.constant 0 : index
    %21 = vector.load %arg4[%c0_9, %c0_10] : memref<8x8xf32, #tpu.memory_space<vmem>>, vector<8x8xf32>
    tpu.vector_store %arg4[%c0_9, %c0_10], %20 {strides = array<i32>} : memref<8x8xf32, #tpu.memory_space<vmem>>, vector<8x8xf32>,
    return
  }
  func.func @transform_0(%arg0: i32) -> (i32, i32, i32) {
    %c0_i32 = arith.constant 0 : i32
    %c0_i32_0 = arith.constant 0 : i32
    %c0_i32_1 = arith.constant 0 : i32
    return %arg0, %c0_i32, %c0_i32_0 : i32, i32, i32
  }
  func.func @transform_1(%arg0: i32) -> (i32, i32) {
    %c0_i32 = arith.constant 0 : i32
    %c0_i32_0 = arith.constant 0 : i32
    return %arg0, %c0_i32 : i32, i32
  }
  func.func @transform_2(%arg0: i32) -> (i32, i32) {
    %c0_i32 = arith.constant 0 : i32
    %c0_i32_0 = arith.constant 0 : i32
    return %arg0, %c0_i32 : i32, i32
  }
  func.func @transform_3(%arg0: i32) -> (i32, i32) {
    %c0_i32 = arith.constant 0 : i32
    %c0_i32_0 = arith.constant 0 : i32
    return %arg0, %c0_i32 : i32, i32
  }
}

</mosaic_0001>

<bundles_post_ra>
// kernel: tpu_custom_call.1
= control target key start
LH: loop header
LB: loop body
LE: loop exit
PB: predicated region body
PF: predicated region fallthrough
CT: control target
= control target key end

     0   :  { %8 = vsyncpa [#allocation3], 0  ;;  %s1208_s0 = inlined_call_operand.hbm [shape: bf16[16,8,32], index: 0, kind: input, shape index: {}]   ;;  %s1209_s1 = inlined_call_operand.vmem [shape: f32[16,8], index: 1, kind: input, shape index: {}]   ;;  %s1210_s2 = inlined_call_operand.vmem [shape: bf16[16,32], index: 2, kind: input, shape index: {}]   ;;  %s1211_s3 = inlined_call_operand.vmem [shape: f32[16,8], index: 3, kind: output, shape index: {}]  }
   0x1   :  { %10 = vsyncpa [#allocation3 + $0x1], 0  ;;  %s1012_s12 = smov 0   ;;  %s1014_s13 = smov 0  }
   0x2   :  { %s1016_s14 = smov 0   ;;  %s1018_s15 = smov 0  }
   0x3 LB: > { %s1031_s16 = sadd.s32 4294967295, %s985_s15   ;;  %s1034_s17 = sadd.s32 1, %s985_s15   ;;  %s985_s15 = sphi %s1018_s15, %s1218_s15   ;;  %s981_s14 = sphi %s1016_s14, %s1217_s14   ;;  %s977_s13 = sphi %s1014_s13, %s1216_s13   ;;  %s973_s12 = sphi %s1012_s12, %s1215_s12  }
   0x4   : > { %s20_s18 = ssub.s32 %s985_s15, %s1034_s17  ;;  %s23_s19 = sadd.s32 1, %s981_s14 }
   0x5   : > { %p21_p0 = scmp.eq.s32.totalorder %s20_s18, 0  ;;  %p30_p1 = scmp.ne.s32.totalorder %s981_s14, %s977_s13 }
   0x6   : > { %p31_p2 = scmp.eq.s32.totalorder %s985_s15, 0  ;;  %p36_p3 = scmp.ne.s32.totalorder %s977_s13, %s973_s12 }
   0x7   : > { %s1044_s20 = scalar_select %p21_p0, %s981_s14, %s23_s19  }
   0x8   : > { %p32_p4 = por %p31_p2, %p30_p1  ;;  %p37_p5 = scmp.eq.s32.totalorder %s1031_s16, 0 }
   0x9   : > { %p818_p6 = scmp.lt.s32.totalorder %s985_s15, 2  ;;  %s138_s22 = sand.u32 1, %s981_s14  }
   0xa   : > { %p1048_p7 = por %p37_p5, %p36_p3  ;;  %s774_s23 = sshll.u32 %s138_s22, 5 }
   0xb   : > { %s792_s24 = sshll.u32 %s985_s15, 9  ;;  %s142_s28 = scalar_lea.vmem [#allocation2], %s774_s23 }
   0xc   : > { %s1057_s27 = scalar_lea.hbm %s1208_s0, %s792_s24  ;;  %s149_s29 = sshll.u32 %s142_s28, 4  ;;  %s1059_s29 = int_to_ptr.vmem [resolvable:$true] %s149_s29 }
   0xd   : > { %p1061_p8 = pnand %p818_p6, %p32_p4  ;;  %s1066_s4 = scalar_lea.sflag [#allocation3], %s138_s22 }
   0xe   : > { %s921_s5 = scalar_lea.hbm %s1057_s27, 512  ;;  %s926_s8 = scalar_lea.hbm %s1208_s0, 1024 }
   0xf   : > { %p922_p10 = scmp.ne.s32.totalorder %s1057_s27, %s921_s5  ;;  %p923_p11 = pneg %p1061_p8 }
  0x10   : > { %p927_p0 = scmp.lt.u32.totalorder %s1057_s27, %s1208_s0  ;;  %p928_p1 = scmp.lt.u32.totalorder %s926_s8, %s921_s5 }
  0x11   : > { %p924_p12 = pnand %p923_p11, %p922_p10  ;;  %p930_p3 = scmp.lt.u32.totalorder %s921_s5, %s1057_s27 }
  0x12   : > { %p929_p2 = por %p928_p1, %p927_p0 }
  0x13   : > { %p925_p13 = pneg %p924_p12 }
  0x14   : > { %p931_p4 = por %p930_p3, %p929_p2 }
  0x16   : > { %p932_p5 = pnand %p931_p4, %p925_p13 }
  0x18   : > { %935 = shalt.err (!%p932_p5)
}
  0x19   : > { %s936_s11 = scalar_lea.vmem %s1059_s29, 512  ;;  %s987_s12 = smov [#allocation2]  }
  0x1a   : > { %p937_p6 = scmp.ne.s32.totalorder %s1059_s29, %s936_s11  ;;  %s941_s18 = sshll.u32 %s987_s12, 4  ;;  %s942_s18 = int_to_ptr.vmem [resolvable:$false] %s941_s18 }
  0x1b   : > { %s943_s19 = scalar_lea.vmem %s942_s18, 1024  ;;  %p944_p9 = scmp.lt.s32.totalorder %s1059_s29, %s942_s18 }
  0x1c   : > { %p939_p10 = pnand %p937_p6, %p923_p11  ;;  %p945_p0 = scmp.lt.s32.totalorder %s943_s19, %s936_s11 }
  0x1e   : > { %p940_p12 = pneg %p939_p10  ;;  %p946_p1 = por %p945_p0, %p944_p9 }
  0x20   : > { %p947_p2 = pnand %p946_p1, %p940_p12 }
  0x22   : > { %950 = shalt.err (!%p947_p2)
}
  0x23   : > { %s988_s22 = smov 64   ;;  %s989_s23 = smov 4  }
  0x24   : > { %817 = dma.hbm_to_vmem [thread:$0]  (!%p1061_p8), %s1057_s27, 512, %s1059_s29, %s1066_s4, %s988_s22, %s988_s22, %s989_s23  }
  0x25   : > { %p171_p11 = scmp.lt.s32.totalorder %s985_s15, 3  ;;  %p1214_p13 = scmp.ge.s32.totalorder %s985_s15, 1 }
  0x27   : > { %p172_p3 = pnand %p1214_p13, %p171_p11 }
  0x28   : > { %s177_s24 = sand.u32 (!%p172_p3), 1, %s977_s13  }
  0x29   : > { %175 = sbr.rel (%p172_p3) target bundleno = 406 (0x196), region = 32  ;;  %s778_s25 = sshll.u32 (!%p172_p3), %s177_s24, 5 }
  0x2a   : > { %s178_s26 = scalar_lea.sflag (!%p172_p3), [#allocation3], %s177_s24  ;;  %s181_s28 = scalar_lea.vmem (!%p172_p3), [#allocation2], %s778_s25 }
  0x30   : > { %968 = dma.done.wait (%p1048_p7), %s178_s26, 512  }
  0x31   : > { %970 = vsyncadd (%p1048_p7), %s178_s26, 4294966784  ;;  %p212_p9 = scmp.lt.s32.totalorder %s1031_s16, 1  ;;  %v990_v0 = vmov 1966171168   ;;  %v247_v2 = vlaneseq  ;;  %v809_v3 = vld [vmem:[%s181_s28 + $0x8] sm:$0xff]   ;;  %v794_v4 = vld [vmem:[%s181_s28] sm:$0xff]  }
  0x32   : > { %v245_v1 = vunpack.c.l.s4 %v990_v0  ;;  %v810_v5 = vld [vmem:[%s181_s28 + $0x10] sm:$0xff]   ;;  %v799_v8 = vunpack.c.l.bf16 %v809_v3  ;;  %v795_v9 = vunpack.c.l.bf16 %v794_v4  ;;  %v800_v10 = vunpack.c.h.bf16 %v809_v3  ;;  %v811_v18 = vld [vmem:[%s181_s28 + $0x18] sm:$0xff]  }
  0x33   : > { %s1220_s16 = smov (!%p212_p9, %s1031_s16), 1  ;;  %v1108_v7 = vshrl.u32 %v247_v2, 7  ;;  %v796_v11 = vunpack.c.h.bf16 %v794_v4  ;;  %vm340_vm0 = vcmask 261120   ;;  %v1113_v12 = vunpack.c.h.bf16 %v810_v5 }
  0x34   : > { %s780_s15 = sshll.u32 %s1220_s16, 2  ;;  %v246_v6 = vunpack.c.0.s8 %v245_v1  ;;  %v803_v13 = vunpack.c.l.bf16 %v810_v5  ;;  %v367_v14 = vmul.f32 %v799_v8, %v799_v8  ;;  %v365_v15 = vmul.f32 %v795_v9, %v795_v9  ;;  %s779_s30 = sshll.u32 %s1220_s16, 3 }
  0x35   : > { %s219_s29 = scalar_lea.vmem %s1210_s2, %s780_s15  ;;  %v368_v16 = vmul.f32 %v800_v10, %v800_v10  ;;  %v366_v17 = vmul.f32 %v796_v11, %v796_v11  ;;  %v370_v23 = vmul.f32 %v1113_v12, %v1113_v12  ;;  %v808_v24 = vunpack.c.h.bf16 %v811_v18  ;;  %s215_s6 = scalar_lea.vmem %s1209_s1, %s779_s30 }
  0x36   : > { %v240_v19 = vld [vmem:[%s219_s29] sm:$0xf]  ;;  %v379_v20 = vsel %vm340_vm0, %v367_v14, 0.0  ;;  %v373_v21 = vsel %vm340_vm0, %v365_v15, 0.0  ;;  %v249_v22 = vsub.s32 %v246_v6, %v1108_v7  ;;  %v807_v25 = vunpack.c.l.bf16 %v811_v18  ;;  %s223_s9 = scalar_lea.vmem %s1211_s3, %s779_s30 }
  0x37   : > { %380 = vadd.xlane.f32.xlu1 %v379_v20  ;;  %374 = vadd.xlane.f32.xlu0 %v373_v21  ;;  %v382_v26 = vsel %vm340_vm0, %v368_v16, 0.0  ;;  %v376_v27 = vsel %vm340_vm0, %v366_v17, 0.0  ;;  %v369_v28 = vmul.f32 %v803_v13, %v803_v13  ;;  %v241_v29 = vunpack.c.l.bf16 %v240_v19 }
  0x38   : > { %v1123_v31 = vsub.s32 0, %v1108_v7  ;;  %v388_v33 = vsel %vm340_vm0, %v370_v23, 0.0  ;;  %v372_v34 = vmul.f32 %v808_v24, %v808_v24  ;;  %v371_v35 = vmul.f32 %v807_v25, %v807_v25 }
  0x39   : > { %v250_v30 = vrot.slane %v241_v29, %v249_v22  ;;  %v243_v32 = vcombine.high %v241_v29, %v241_v29  ;;  %v385_v36 = vsel %vm340_vm0, %v369_v28, 0.0  ;;  %v495_v15 = vsub.s32 2, %v1108_v7 }
  0x3a   : > { %v394_v44 = vsel %vm340_vm0, %v372_v34, 0.0  ;;  %v391_v45 = vsel %vm340_vm0, %v371_v35, 0.0  ;;  %v502_v17 = vsub.s32 3, %v1108_v7  ;;  %v509_v19 = vsub.s32 4, %v1108_v7 }
  0x3b   : > { %383 = vadd.xlane.f32.xlu1 %v382_v26  ;;  %377 = vadd.xlane.f32.xlu0 %v376_v27  ;;  %v258_v37 = vcombine.high %v250_v30, %v250_v30  ;;  %v266_v38 = vrot.slane %v250_v30, %v249_v22  ;;  %v257_v39 = vrot.slane %v243_v32, %v249_v22  ;;  %v516_v21 = vsub.s32 5, %v1108_v7 }
  0x3c   : > { %v523_v23 = vsub.s32 6, %v1108_v7  ;;  %v991_v28 = vmov 0  }
  0x3d   : > { %v280_v40 = vrot.slane %v258_v37, %v249_v22  ;;  %v295_v41 = vrot.slane %v266_v38, %v1123_v31  ;;  %v288_v42 = vcombine.high %v266_v38, %v266_v38  ;;  %v259_v43 = vcombine.high %v257_v39, %v257_v39  ;;  %855 = vset.pattern.permute.xlu0 %v991_v28 }
  0x3e   : > { %v273_v46 = vrot.slane %v257_v39, %v249_v22  ;;  %856 = vset.pattern.permute.xlu1 %v991_v28 }
  0x3f   : > { %389 = vadd.xlane.f32.xlu1 %v388_v33  ;;  %386 = vadd.xlane.f32.xlu0 %v385_v36  ;;  %v299_v47 = vrot.slane %v280_v40, %v1123_v31  ;;  %v332_v48 = vmul.f32 %v795_v9, %v295_v41  ;;  %v290_v49 = vcombine.high %v280_v40, %v280_v40 }
  0x40   : > { %v303_v50 = vrot.slane %v288_v42, %v1123_v31  ;;  %v287_v51 = vrot.slane %v259_v43, %v249_v22  ;;  %v311_v56 = vrot.slane %v273_v46, %v1123_v31  ;;  %v289_v57 = vcombine.high %v273_v46, %v273_v46 }
  0x41   : > { %v333_v52 = vmul.f32 %v796_v11, %v299_v47  ;;  %v307_v53 = vrot.slane %v290_v49, %v1123_v31  ;;  %v341_v54 = vsel %vm340_vm0, %v332_v48, 0.0 }
  0x42   : > { %v334_v55 = vmul.f32 %v799_v8, %v303_v50  ;;  %v315_v60 = vrot.slane %v287_v51, %v1123_v31  ;;  %v291_v61 = vcombine.high %v287_v51, %v287_v51  ;;  %v336_v63 = vmul.f32 %v803_v13, %v311_v56  ;;  %v477_v13 = vld [vmem:[%s215_s6] sm:$0xff] }
  0x43   : > { %395 = vadd.xlane.f32.xlu1 %v394_v44  ;;  %392 = vadd.xlane.f32.xlu0 %v391_v45  ;;  %v344_v58 = vsel %vm340_vm0, %v333_v52, 0.0  ;;  %v335_v59 = vmul.f32 %v800_v10, %v307_v53  ;;  %v319_v4 = vrot.slane %v289_v57, %v1123_v31  ;;  %v496_v16 = vrot.slane %v477_v13, %v495_v15 }
  0x44   : > { %v347_v62 = vsel %vm340_vm0, %v334_v55, 0.0  ;;  %v337_v1 = vmul.f32 %v1113_v12, %v315_v60  ;;  %v323_v3 = vrot.slane %v291_v61, %v1123_v31  ;;  %v353_v6 = vsel %vm340_vm0, %v336_v63, 0.0 }
  0x45   : > { %v350_v0 = vsel %vm340_vm0, %v335_v59, 0.0  ;;  %v338_v9 = vmul.f32 %v807_v25, %v319_v4  ;;  %v488_v12 = vsub.s32 1, %v1108_v7  ;;  %v482_v18 = vrot.slane %v477_v13, %v1123_v31 }
  0x46   : > { %v356_v5 = vsel %vm340_vm0, %v337_v1, 0.0  ;;  %v339_v8 = vmul.f32 %v808_v24, %v323_v3  ;;  %v503_v20 = vrot.slane %v477_v13, %v502_v17  ;;  %v510_v22 = vrot.slane %v477_v13, %v509_v19 }
  0x47   : > { %345 = vadd.xlane.f32.xlu1 %v344_v58  ;;  %342 = vadd.xlane.f32.xlu0 %v341_v54  ;;  %v359_v11 = vsel %vm340_vm0, %v338_v9, 0.0  ;;  %v489_v14 = vrot.slane %v477_v13, %v488_v12  ;;  %v517_v24 = vrot.slane %v477_v13, %v516_v21  ;;  %v530_v25 = vsub.s32 7, %v1108_v7 }
  0x48   : > { %v362_v10 = vsel %vm340_vm0, %v339_v8, 0.0  ;;  %v524_v26 = vrot.slane %v477_v13, %v523_v23 }
  0x49   : > { %v531_v27 = vrot.slane %v477_v13, %v530_v25 }
  0x4b   : > { %351 = vadd.xlane.f32.xlu1 %v350_v0  ;;  %348 = vadd.xlane.f32.xlu0 %v347_v62 }
  0x4f   : > { %357 = vadd.xlane.f32.xlu1 %v356_v5  ;;  %354 = vadd.xlane.f32.xlu0 %v353_v6 }
  0x53   : > { %363 = vadd.xlane.f32.xlu1 %v362_v10  ;;  %360 = vadd.xlane.f32.xlu0 %v359_v11 }
  0x64   : > { %491 = vbcast.lane.b32.xlu1 %v489_v14, 256 }
  0x68   : > { %498 = vbcast.lane.b32.xlu1 %v496_v16, 256 }
  0x69   : > { %484 = vbcast.lane.b32.xlu0 %v482_v18, 256 }
  0x6c   : > { %505 = vbcast.lane.b32.xlu1 %v503_v20, 256 }
  0x6d   : > { %512 = vbcast.lane.b32.xlu0 %v510_v22, 256 }
  0x70   : > { %519 = vbcast.lane.b32.xlu1 %v517_v24, 256 }
  0x71   : > { %526 = vbcast.lane.b32.xlu0 %v524_v26, 256 }
  0x74   : > { %533 = vbcast.lane.b32.xlu1 %v531_v27, 256 }
  0xc4   : > { %v381_v29 = vpop.xlane.xlu1 %380  ;;  %v375_v30 = vpop.xlane.xlu0 %374 }
  0xc5   : > { %857 = vrsqrt.f32 %v381_v29  ;;  %vm413_vm1 = vcmp.eq.f32.partialorder %v381_v29, inf  ;;  %vm415_vm2 = vcmp.eq.f32.partialorder %v381_v29, 0.0  ;;  %v416_v40 = vand.u32 2147483648, %v381_v29 }
  0xc6   : > { %859 = vrsqrt.f32 %v375_v30  ;;  %vm399_vm3 = vcmp.eq.f32.partialorder %v375_v30, inf  ;;  %v402_v43 = vand.u32 2147483648, %v375_v30  ;;  %vm401_vm4 = vcmp.eq.f32.partialorder %v375_v30, 0.0 }
  0xc8   : > { %v384_v31 = vpop.xlane.xlu1 %383  ;;  %v378_v32 = vpop.xlane.xlu0 %377 }
  0xc9   : > { %861 = vrsqrt.f32 %v384_v31  ;;  %vm420_vm5 = vcmp.eq.f32.partialorder %v384_v31, inf  ;;  %vm422_vm6 = vcmp.eq.f32.partialorder %v384_v31, 0.0  ;;  %v423_v52 = vand.u32 2147483648, %v384_v31 }
  0xca   : > { %863 = vrsqrt.f32 %v378_v32  ;;  %vm406_vm7 = vcmp.eq.f32.partialorder %v378_v32, inf  ;;  %v409_v56 = vand.u32 2147483648, %v378_v32  ;;  %vm408_vm8 = vcmp.eq.f32.partialorder %v378_v32, 0.0 }
  0xcc   : > { %v390_v33 = vpop.xlane.xlu1 %389  ;;  %v1160_v34 = vpop.xlane.xlu0 %386 }
  0xcd   : > { %865 = vrsqrt.f32 %v390_v33  ;;  %vm434_vm9 = vcmp.eq.f32.partialorder %v390_v33, inf  ;;  %vm436_vm10 = vcmp.eq.f32.partialorder %v390_v33, 0.0  ;;  %v437_v3 = vand.u32 2147483648, %v390_v33 }
  0xce   : > { %867 = vrsqrt.f32 %v1160_v34  ;;  %vm427_vm11 = vcmp.eq.f32.partialorder %v1160_v34, inf  ;;  %v430_v8 = vand.u32 2147483648, %v1160_v34  ;;  %vm429_vm12 = vcmp.eq.f32.partialorder %v1160_v34, 0.0 }
  0xcf   : > { %v858_v35 = vpop.eup %857 }
  0xd0   : > { %v860_v36 = vpop.eup %859  ;;  %v412_v37 = vmul.f32 %v858_v35, %v381_v29  ;;  %v1163_v38 = vpop.xlane.xlu1 %395 }
  0xd1   : > { %v1165_v39 = vpop.xlane.xlu0 %392  ;;  %v398_v41 = vmul.f32 %v860_v36, %v375_v30  ;;  %869 = vrsqrt.f32 %v1163_v38  ;;  %vm448_vm13 = vcmp.eq.f32.partialorder %v1163_v38, inf  ;;  %vm450_vm14 = vcmp.eq.f32.partialorder %v1163_v38, 0.0 }
  0xd2   : > { %v414_v42 = vsel %vm413_vm1, %v381_v29, %v412_v37  ;;  %871 = vrsqrt.f32 %v1165_v39  ;;  %v451_v18 = vand.u32 2147483648, %v1163_v38  ;;  %vm441_vm15 = vcmp.eq.f32.partialorder %v1165_v39, inf }
  0xd3   : > { %v862_v44 = vpop.eup %861  ;;  %v400_v45 = vsel %vm399_vm3, %v375_v30, %v398_v41  ;;  %v417_v46 = vsel %vm415_vm2, %v416_v40, %v414_v42  ;;  %v444_v22 = vand.u32 2147483648, %v1165_v39  ;;  %vm443_vm0 = vcmp.eq.f32.partialorder %v1165_v39, 0.0 }
  0xd4   : > { %v864_v47 = vpop.eup %863  ;;  %v419_v48 = vmul.f32 %v862_v44, %v384_v31  ;;  %v1169_v49 = vpop.xlane.xlu1 %345  ;;  %v403_v50 = vsel %vm401_vm4, %v402_v43, %v400_v45  ;;  %v455_v57 = vmax.f32 %v417_v46, 1e-12  ;;  %vm665_vm1 = vcmask 1041409  }
  0xd5   : > { %v343_v51 = vpop.xlane.xlu0 %342  ;;  %v405_v53 = vmul.f32 %v864_v47, %v378_v32  ;;  %v453_v54 = vmax.f32 %v403_v50, 1e-12  ;;  %vm667_vm2 = vcmask 1042434   ;;  %vm669_vm3 = vcmask 1043459  }
  0xd6   : > { %v421_v55 = vsel %vm420_vm5, %v384_v31, %v419_v48  ;;  %vm671_vm4 = vcmask 1044484   ;;  %vm673_vm5 = vcmask 1045509  }
  0xd7   : > { %v866_v58 = vpop.eup %865  ;;  %v407_v59 = vsel %vm406_vm7, %v378_v32, %v405_v53  ;;  %873 = vrcp.f32 %v453_v54  ;;  %v424_v60 = vsel %vm422_vm6, %v423_v52, %v421_v55  ;;  %vm675_vm6 = vcmask 1046534  }
  0xd8   : > { %v868_v61 = vpop.eup %867  ;;  %v433_v62 = vmul.f32 %v866_v58, %v390_v33  ;;  %v410_v63 = vsel %vm408_vm8, %v409_v56, %v407_v59  ;;  %v352_v0 = vpop.xlane.xlu1 %351  ;;  %v456_v9 = vmax.f32 %v424_v60, 1e-12  ;;  %875 = vrcp.f32 %v455_v57 }
  0xd9   : > { %v349_v1 = vpop.xlane.xlu0 %348  ;;  %v426_v4 = vmul.f32 %v868_v61, %v1160_v34  ;;  %v454_v5 = vmax.f32 %v410_v63, 1e-12  ;;  %vm677_vm7 = vcmask 1047559   ;;  %vm680_vm8 = vcmask 64512  }
  0xda   : > { %v435_v6 = vsel %vm434_vm9, %v390_v33, %v433_v62 }
  0xdb   : > { %v870_v10 = vpop.eup %869  ;;  %v428_v11 = vsel %vm427_vm11, %v1160_v34, %v426_v4  ;;  %877 = vrcp.f32 %v454_v5  ;;  %v438_v12 = vsel %vm436_vm10, %v437_v3, %v435_v6 }
  0xdc   : > { %v872_v13 = vpop.eup %871  ;;  %v447_v14 = vmul.f32 %v870_v10, %v1163_v38  ;;  %v358_v15 = vpop.xlane.xlu1 %357  ;;  %v431_v16 = vsel %vm429_vm12, %v430_v8, %v428_v11  ;;  %879 = vrcp.f32 %v456_v9  ;;  %v458_v23 = vmax.f32 %v438_v12, 1e-12 }
  0xdd   : > { %v355_v17 = vpop.xlane.xlu0 %354  ;;  %v440_v19 = vmul.f32 %v872_v13, %v1165_v39  ;;  %v457_v20 = vmax.f32 %v431_v16, 1e-12 }
  0xde   : > { %v449_v21 = vsel %vm448_vm13, %v1163_v38, %v447_v14 }
  0xdf   : > { %v442_v24 = vsel %vm441_vm15, %v1165_v39, %v440_v19  ;;  %881 = vrcp.f32 %v457_v20  ;;  %v452_v25 = vsel %vm450_vm14, %v451_v18, %v449_v21 }
  0xe0   : > { %v364_v26 = vpop.xlane.xlu1 %363  ;;  %v445_v27 = vsel %vm443_vm0, %v444_v22, %v442_v24  ;;  %883 = vrcp.f32 %v458_v23  ;;  %v460_v31 = vmax.f32 %v452_v25, 1e-12 }
  0xe1   : > { %v361_v28 = vpop.xlane.xlu0 %360  ;;  %v874_v29 = vpop.eup %873  ;;  %v459_v30 = vmax.f32 %v445_v27, 1e-12 }
  0xe2   : > { %v462_v32 = vmul.f32 %v874_v29, %v343_v51  ;;  %v876_v33 = vpop.eup %875 }
  0xe3   : > { %885 = vrcp.f32 %v459_v30  ;;  %v466_v39 = vmul.f32 %v876_v33, %v349_v1  ;;  %v632_v33 = vand.u32 127, %v247_v2 }
  0xe4   : > { %v492_v34 = vpop.permute.xlu1 %491  ;;  %887 = vrcp.f32 %v460_v31 }
  0xe5   : > { %v485_v35 = vpop.permute.xlu0 %484  ;;  %v878_v36 = vpop.eup %877 }
  0xe6   : > { %v543_v37 = vadd.f32 %v485_v35, %v462_v32  ;;  %v464_v38 = vmul.f32 %v878_v36, %v1169_v49  ;;  %v880_v41 = vpop.eup %879 }
  0xe7   : > { %v468_v50 = vmul.f32 %v880_v41, %v352_v0 }
  0xe8   : > { %v782_v40 = vmul.f32 -1.442695, %v543_v37  ;;  %v544_v42 = vadd.f32 %v492_v34, %v464_v38  ;;  %v499_v43 = vpop.permute.xlu1 %498  ;;  %v635_v34 = vsub.s32 %v632_v33, %v1108_v7 }
  0xe9   : > { %v513_v44 = vpop.permute.xlu0 %512  ;;  %v882_v45 = vpop.eup %881  ;;  %v545_v46 = vadd.f32 %v499_v43, %v466_v39 }
  0xea   : > { %889 = vpow2.f32 %v782_v40  ;;  %v470_v47 = vmul.f32 %v882_v45, %v355_v17  ;;  %v783_v48 = vmul.f32 -1.442695, %v544_v42  ;;  %v884_v52 = vpop.eup %883 }
  0xeb   : > { %v784_v51 = vmul.f32 -1.442695, %v545_v46  ;;  %v472_v59 = vmul.f32 %v884_v52, %v358_v15 }
  0xec   : > { %891 = vpow2.f32 %v783_v48  ;;  %v547_v53 = vadd.f32 %v513_v44, %v470_v47  ;;  %v506_v54 = vpop.permute.xlu1 %505 }
  0xed   : > { %v886_v55 = vpop.eup %885  ;;  %893 = vpow2.f32 %v784_v51  ;;  %v546_v49 = vadd.f32 %v506_v54, %v468_v50  ;;  %v527_v56 = vpop.permute.xlu0 %526 }
  0xee   : > { %v474_v57 = vmul.f32 %v886_v55, %v361_v28  ;;  %v786_v58 = vmul.f32 -1.442695, %v547_v53  ;;  %v888_v61 = vpop.eup %887 }
  0xef   : > { %v785_v60 = vmul.f32 -1.442695, %v546_v49  ;;  %v476_v4 = vmul.f32 %v888_v61, %v364_v26 }
  0xf0   : > { %895 = vpow2.f32 %v786_v58  ;;  %v549_v62 = vadd.f32 %v527_v56, %v474_v57  ;;  %v520_v63 = vpop.permute.xlu1 %519 }
  0xf1   : > { %897 = vpow2.f32 %v785_v60  ;;  %v548_v1 = vadd.f32 %v520_v63, %v472_v59 }
  0xf2   : > { %v788_v0 = vmul.f32 -1.442695, %v549_v62 }
  0xf3   : > { %v787_v5 = vmul.f32 -1.442695, %v548_v1 }
  0xf4   : > { %v890_v3 = vpop.eup %889  ;;  %899 = vpow2.f32 %v788_v0  ;;  %v534_v8 = vpop.permute.xlu1 %533 }
  0xf5   : > { %v575_v6 = vadd.f32 1.0, %v890_v3  ;;  %901 = vpow2.f32 %v787_v5  ;;  %v550_v9 = vadd.f32 %v534_v8, %v476_v4 }
  0xf6   : > { %v892_v10 = vpop.eup %891 }
  0xf7   : > { %903 = vrcp.f32 %v575_v6  ;;  %v894_v11 = vpop.eup %893  ;;  %v576_v12 = vadd.f32 1.0, %v892_v10  ;;  %v789_v13 = vmul.f32 -1.442695, %v550_v9 }
  0xf8   : > { %v577_v14 = vadd.f32 1.0, %v894_v11 }
  0xf9   : > { %905 = vrcp.f32 %v576_v12 }
  0xfa   : > { %v896_v15 = vpop.eup %895  ;;  %907 = vpow2.f32 %v789_v13 }
  0xfb   : > { %v898_v16 = vpop.eup %897  ;;  %909 = vrcp.f32 %v577_v14  ;;  %v579_v18 = vadd.f32 1.0, %v896_v15 }
  0xfc   : > { %v578_v17 = vadd.f32 1.0, %v898_v16 }
  0xfe   : > { %v900_v19 = vpop.eup %899  ;;  %911 = vrcp.f32 %v578_v17 }
  0xff   : > { %v902_v20 = vpop.eup %901  ;;  %913 = vrcp.f32 %v579_v18  ;;  %v581_v23 = vadd.f32 1.0, %v900_v19 }
 0x100   : > { %v580_v22 = vadd.f32 1.0, %v902_v20 }
 0x101   : > { %v904_v21 = vpop.eup %903 }
 0x102   : > { %608 = vperm.xlu0 %855, %v904_v21   ;;  %915 = vrcp.f32 %v580_v22 }
 0x103   : > { %v906_v24 = vpop.eup %905  ;;  %917 = vrcp.f32 %v581_v23 }
 0x104   : > { %611 = vperm.xlu1 %856, %v906_v24   ;;  %v908_v25 = vpop.eup %907 }
 0x105   : > { %v582_v26 = vadd.f32 1.0, %v908_v25  ;;  %v910_v27 = vpop.eup %909 }
 0x107   : > { %919 = vrcp.f32 %v582_v26 }
 0x108   : > { %v912_v28 = vpop.eup %911  ;;  %614 = vperm.xlu1 %856, %v910_v27  }
 0x109   : > { %617 = vperm.xlu0 %855, %v912_v28   ;;  %v914_v29 = vpop.eup %913 }
 0x10c   : > { %v916_v30 = vpop.eup %915  ;;  %620 = vperm.xlu1 %856, %v914_v29  }
 0x10d   : > { %623 = vperm.xlu0 %855, %v916_v30   ;;  %v918_v31 = vpop.eup %917 }
 0x110   : > { %626 = vperm.xlu1 %856, %v918_v31  }
 0x111   : > { %v920_v32 = vpop.eup %919 }
 0x112   : > { %629 = vperm.xlu0 %855, %v920_v32  }
 0x181   : > { %v609_v36 = vpop.permute.xlu0 %608 }
 0x182   : > { %v636_v38 = vrot.slane %v609_v36, %v635_v34 }
 0x183   : > { %v612_v35 = vpop.permute.xlu1 %611 }
 0x184   : > { %v640_v37 = vrot.slane %v612_v35, %v635_v34 }
 0x186   : > { %v666_v42 = vsel %vm665_vm1, %v640_v37, %v636_v38 }
 0x187   : > { %v615_v39 = vpop.permute.xlu1 %614 }
 0x188   : > { %v644_v40 = vrot.slane %v615_v39, %v635_v34  ;;  %v618_v41 = vpop.permute.xlu0 %617 }
 0x189   : > { %v648_v43 = vrot.slane %v618_v41, %v635_v34 }
 0x18a   : > { %v668_v44 = vsel %vm667_vm2, %v644_v40, %v666_v42 }
 0x18b   : > { %v670_v45 = vsel %vm669_vm3, %v648_v43, %v668_v44  ;;  %v621_v46 = vpop.permute.xlu1 %620 }
 0x18c   : > { %v652_v2 = vrot.slane %v621_v46, %v635_v34  ;;  %v624_v7 = vpop.permute.xlu0 %623 }
 0x18d   : > { %v656_v47 = vrot.slane %v624_v7, %v635_v34 }
 0x18e   : > { %v672_v48 = vsel %vm671_vm4, %v652_v2, %v670_v45 }
 0x18f   : > { %v674_v50 = vsel %vm673_vm5, %v656_v47, %v672_v48  ;;  %v627_v51 = vpop.permute.xlu1 %626 }
 0x190   : > { %v660_v52 = vrot.slane %v627_v51, %v635_v34 }
 0x191   : > { %v630_v54 = vpop.permute.xlu0 %629 }
 0x192   : > { %v676_v53 = vsel %vm675_vm6, %v660_v52, %v674_v50  ;;  %v664_v55 = vrot.slane %v630_v54, %v635_v34 }
 0x194   : > { %v678_v49 = vsel %vm677_vm7, %v664_v55, %v676_v53 }
 0x195   : > { %681 = vst.msk [vmem:[%s223_s9] sm:$0xff] %vm680_vm8, %v678_v49 }
 0x196 PF: > { %p13_p7 = scmp.ge.s32.totalorder %s1034_s17, 4   ;;  %s1215_s12 = smov %s977_s13 }
 0x197   : > { %s1216_s13 = smov %s981_s14  ;;  %s1217_s14 = smov %s1044_s20 }
 0x198   : > { %s1218_s15 = smov %s1034_s17  ;;  %15 = sbr.rel (!%p13_p7) target bundleno = 3 (0x3), region = 78 }
 0x19f   :  { %701 = vsyncpa [#allocation3], 1 }
 0x1a0   :  { %703 = vsyncpa [#allocation3 + $0x1], 1 }

</bundles_post_ra>
